<compile_context>
chip_gen: v5e
topology: v5e:2x2
jax: 0.10.0
libtpu: 0.0.40
codegen_flags: <defaults>
</compile_context>

<pallas_src>
import functools
import math

import jax
import jax.numpy as jnp
from jax.experimental import pallas as pl
from jax.experimental.pallas import tpu as pltpu


# ----------------------------- Pallas kernel --------------------------------
def value_net_kernel(
    packed_ref,     # [bb, W, 3+Cp]  raw (high, low, close, proc...) windows
    aep_ref,        # [bb, 1]        avg entry price
    pos_rows_ref,   # [bb, H]        (w_pos @ w1)[position]  (row gather, wrapper)
    w_data_ref,     # [3+Cp, H]      w_data @ w1            (fused, exact)
    b_data_ref,     # [1, H]         b_data @ w1 + b1
    w_aep_ref,      # [1, H]         w_pos[aep row] @ w1
    b_pos_ref,      # [1, H]         b_pos @ w1 + b1
    w_head_ref,     # [1, H]         (w2 @ w_out).T          (fused, exact)
    b_head_ref,     # [1, 1]         b2 @ w_out + b_out
    out_ref,        # [1, bb]        lane-dense output row
):
    bb, W, Cd = packed_ref.shape
    H = w_data_ref.shape[1]
    packed = packed_ref[...]                               # [bb, W, Cd] f32

    # ---- EnvOutTransform elementwise scaling (price lanes only, lane mask) --
    close_last = packed[:, W - 1:W, 2:3]                   # [bb, 1, 1] last close
    lane = jax.lax.broadcasted_iota(jnp.int32, (bb, W, Cd), 2)
    is_price = lane < 3
    safe = jnp.where(is_price, packed / close_last, 1.0)   # safe-where: no NaN
    scaled = jnp.where(is_price, jnp.log(safe), packed)    # log(price/close) | proc

    aep = aep_ref[...]                                     # [bb, 1]
    close_b = packed[:, W - 1, 2:3]                        # [bb, 1]
    safe_aep = jnp.where(aep > 0.0, aep, 1.0)
    aep_scaled = jnp.where(aep > 0.0, jnp.log(safe_aep / close_b), 0.0)

    # ---- (lin_data ∘ w1) fused: ONE matmul over all data tokens -------------
    x2 = scaled.reshape(bb * W, Cd).astype(w_data_ref.dtype)
    h_data = jnp.maximum(
        jnp.dot(x2, w_data_ref[...], preferred_element_type=jnp.float32)
        + b_data_ref[...], 0.0)                            # [bb*W, H]
    h_data_sum = h_data.reshape(bb, W, H).sum(axis=1)      # [bb, H]

    # ---- (lin_pos ∘ w1) fused: VPU only --------------------------------------
    h_pos = jnp.maximum(
        pos_rows_ref[...] + aep_scaled * w_aep_ref[...] + b_pos_ref[...], 0.0)

    # ---- mean-pool over W+1 tokens + folded (w2 @ w_out) head ----------------
    m = (h_data_sum + h_pos) * (1.0 / (W + 1))             # [bb, H] = mean(h, tokens)
    v = jnp.sum(m * w_head_ref[...], axis=-1)              # [bb]  VPU mul + lane reduce
    out_ref[...] = (v.reshape(1, bb) + b_head_ref[...]).astype(out_ref.dtype)


# ------------------------------ small helpers --------------------------------
def _batch_block(batch, max_block=256):
    """Largest block <= max_block dividing batch; multiples of 128 when < batch
    so every BlockSpec dim is either full-extent or a multiple of (8, 128)."""
    if batch <= max_block:
        return batch
    bb = (max_block // 128) * 128
    while bb >= 128:
        if batch % bb == 0:
            return bb
        bb -= 128
    return batch


def _padded_bytes(shape, itemsize=4):
    """f32 VMEM footprint of a tile after (8, 128) sublane/lane padding."""
    shape = tuple(shape)
    if len(shape) == 1:
        shape = (1,) + shape
    lead = math.prod(shape[:-2]) if len(shape) > 2 else 1
    sub = -(-shape[-2] // 8) * 8
    lane = -(-shape[-1] // 128) * 128
    return lead * sub * lane * itemsize


# ------------------------------- wrapper -------------------------------------
def value_net_forward(date_idx, time_idx, position, avg_entry_price,
                      env_data, proc_data, params, *, window_size, n_position,
                      max_batch_block=256, matmul_dtype=jnp.float32):
    B = date_idx.shape[0]
    W = window_size
    n_times = env_data.shape[1]
    Cp = proc_data.shape[-1]
    Cd = 3 + Cp
    H = params["w1"].shape[1]
    P = n_position

    bb = _batch_block(B, max_batch_block)
    nb = B // bb
    assert nb * bb == B, "batch block must divide B"

    # ---- window gather in the wrapper (one HBM pass; pipelined as a block) ---
    time_i32 = jnp.clip(time_idx.astype(jnp.int32), W, n_times)   # OOB guard
    date_i32 = date_idx.astype(jnp.int32)
    rng = jnp.arange(-W, 0, dtype=jnp.int32)
    t_idx = time_i32[:, None] + rng[None, :]                      # [B, W]
    d_idx = date_i32[:, None]                                     # [B, 1]
    data_win = env_data[d_idx, t_idx, 2:5]                        # high, low, close
    proc_win = proc_data[d_idx, t_idx, :]                         # [B, W, Cp]
    packed = jnp.concatenate([data_win, proc_win], axis=-1).astype(jnp.float32)

    # ---- fold the linear chain (exact algebra; tiny wrapper-side matmuls) ----
    hp = jax.lax.Precision.HIGHEST
    w1, b1 = params["w1"], params["b1"]
    w_data_w1 = jnp.dot(params["w_data"], w1, precision=hp)            # [Cd, H]
    b_data_w1 = (jnp.dot(params["b_data"], w1, precision=hp) + b1)[None, :]
    w_pos_w1 = jnp.dot(params["w_pos"], w1, precision=hp)              # [P+1, H]
    b_pos_w1 = (jnp.dot(params["b_pos"], w1, precision=hp) + b1)[None, :]
    pos_rows_w1 = jnp.take(w_pos_w1[:P], position, axis=0)             # [B, H]
    w_aep_w1 = w_pos_w1[P:P + 1, :]                                    # [1, H]
    w_head = jnp.dot(params["w2"], params["w_out"], precision=hp).T    # [1, H]
    b_head = (jnp.dot(params["b2"], params["w_out"], precision=hp)
              + params["b_out"])[None, :]                              # [1, 1]

    aep = avg_entry_price[:, None].astype(jnp.float32)                 # [B, 1]

    # Optional bf16 MXU operands for v6e/v7x (f32 default keeps parity with ref).
    w_data_w1 = w_data_w1.astype(matmul_dtype)

    const = lambda i: (0, 0)
    batched = lambda i: (i, 0)
    in_specs = [
        pl.BlockSpec((bb, W, Cd), lambda i: (i, 0, 0)),   # packed windows
        pl.BlockSpec((bb, 1), batched),                   # aep
        pl.BlockSpec((bb, H), batched),                   # pos_rows_w1
        pl.BlockSpec((Cd, H), const),                     # w_data_w1 (fused)
        pl.BlockSpec((1, H), const),                      # b_data_w1
        pl.BlockSpec((1, H), const),                      # w_aep_w1
        pl.BlockSpec((1, H), const),                      # b_pos_w1
        pl.BlockSpec((1, H), const),                      # w_head
        pl.BlockSpec((1, 1), const),                      # b_head
    ]
    out_specs = pl.BlockSpec((1, bb), lambda i: (0, i))   # lane-dense output row

    # VMEM budget from (8,128)-padded tile sizes: double-buffered blocks +
    # padded intermediates + headroom; floored at 32 MiB, capped for v7x.
    block_bytes = sum(_padded_bytes(s) for s in
                      [(bb, W, Cd), (bb, 1), (bb, H), (Cd, H), (1, H), (1, H),
                       (1, H), (1, H), (1, 1), (1, bb)])
    interm_bytes = sum(_padded_bytes(s) for s in
                       [(bb, W, Cd), (bb * W, H), (bb, H), (bb, H)])
    vmem_limit = int(min(48 * 2**20,
                         max(32 * 2**20, 2 * block_bytes + interm_bytes + (4 << 20))))

    cparams = pltpu.CompilerParams(
        dimension_semantics=("parallel",),
        vmem_limit_bytes=vmem_limit,
    )
    cost = pl.CostEstimate(
        flops=int(2 * B * W * Cd * H + 8 * B * W * Cd + 10 * B * H),
        transcendentals=int(B * (3 * W + 1)),
        bytes_accessed=int(4 * (B * W * Cd + B * (H + 2) + Cd * H + 5 * H + 1 + B)),
    )

    out_row = pl.pallas_call(
        value_net_kernel,
        out_shape=jax.ShapeDtypeStruct((1, B), jnp.float32),
        grid=(nb,),
        in_specs=in_specs,
        out_specs=out_specs,
        compiler_params=cparams,
        cost_estimate=cost,
    )(packed, aep, pos_rows_w1, w_data_w1, b_data_w1, w_aep_w1, b_pos_w1,
      w_head, b_head)

    return out_row.reshape(B, 1)


# -------------------------- pure-JAX reference --------------------------------
def value_net_reference(date_idx, time_idx, position, avg_entry_price,
                        env_data, proc_data, params, *, window_size, n_position):
    W = window_size
    rng = jnp.arange(-W, 0, dtype=jnp.int32)
    t_idx = time_idx[:, None] + rng[None, :]
    d_idx = date_idx[:, None]
    data = env_data[d_idx, t_idx, 2:5]
    proc = proc_data[d_idx, t_idx, :]
    one_hot = jax.nn.one_hot(position, n_position, dtype=jnp.float32)

    close_last = data[:, -1, 2]
    data_scaled = jnp.log(data / close_last[:, None, None])
    safe_aep = jnp.where(avg_entry_price > 0.0, avg_entry_price, 1.0)
    aep_scaled = jnp.where(avg_entry_price > 0.0,
                           jnp.log(safe_aep / close_last), 0.0)
    packed_data = jnp.concatenate([data_scaled, proc], axis=-1)
    packed_pos = jnp.concatenate([one_hot, aep_scaled[:, None]], axis=-1)

    data_out = packed_data @ params["w_data"] + params["b_data"]   # [B, W, D]
    pos_out = packed_pos @ params["w_pos"] + params["b_pos"]       # [B, D]
    x = jnp.concatenate([data_out, pos_out[:, None, :]], axis=-2)  # [B, W+1, D]

    h = jax.nn.relu(x @ params["w1"] + params["b1"])
    y = h @ params["w2"] + params["b2"]

    m = jnp.mean(y, axis=-2)                                       # [B, D]
    return m @ params["w_out"] + params["b_out"]


# ----------------------------------- main -------------------------------------
if __name__ == "__main__":
    key = jax.random.PRNGKey(0)

    # Small shapes consistent with the module.
    n_dates, n_times = 4, 32
    window_size = 8
    Cp = 4                 # proc_data channels
    d_model = 32
    hidden = 64
    max_units = 5
    n_position = 2 * max_units + 1   # 11
    B = 2

    keys = jax.random.split(key, 12)

    # env.data: [n_dates, n_times, 6] (time, open, high, low, close, volume),
    # prices positive (they are log-scaled inside the forward pass).
    prices = 100.0 + 5.0 * jax.random.uniform(keys[0], (n_dates, n_times, 4))
    times = jnp.broadcast_to(jnp.arange(n_times, dtype=jnp.float32)[None, :, None],
                             (n_dates, n_times, 1)) * 60.0
    volume = 10.0 + jax.random.uniform(keys[1], (n_dates, n_times, 1))
    env_data = jnp.concatenate([times, prices, volume], axis=-1).astype(jnp.float32)

    proc_data = jax.random.normal(keys[2], (n_dates, n_times, Cp), jnp.float32)

    # Deterministic parameter init (LazyLinear-style fan-in scaling).
    def lin(k, fan_in, fan_out):
        return (jax.random.normal(k, (fan_in, fan_out), jnp.float32)
                / jnp.sqrt(jnp.float32(fan_in)))

    params = {
        "w_data": lin(keys[3], 3 + Cp, d_model),
        "b_data": 0.01 * jax.random.normal(keys[4], (d_model,), jnp.float32),
        "w_pos": lin(keys[5], n_position + 1, d_model),
        "b_pos": 0.01 * jax.random.normal(keys[6], (d_model,), jnp.float32),
        "w1": lin(keys[7], d_model, hidden),
        "b1": 0.01 * jax.random.normal(keys[8], (hidden,), jnp.float32),
        "w2": lin(keys[9], hidden, d_model),
        "b2": 0.01 * jax.random.normal(keys[10], (d_model,), jnp.float32),
        "w_out": lin(keys[11], d_model, 1),
        "b_out": jnp.zeros((1,), jnp.float32),
    }

    # Example inputs.
    date_idx = jnp.array([0, 2], dtype=jnp.int32)
    time_idx = jnp.array([10, 20], dtype=jnp.int32)        # >= window_size
    position = jnp.array([3, 7], dtype=jnp.int32)          # in [0, n_position)
    avg_entry_price = jnp.array([101.5, 0.0], dtype=jnp.float32)

    fwd = functools.partial(value_net_forward,
                            window_size=window_size, n_position=n_position)
    out = fwd(date_idx, time_idx, position, avg_entry_price,
              env_data, proc_data, params)
    out = jax.block_until_ready(out)

    ref = value_net_reference(date_idx, time_idx, position, avg_entry_price,
                              env_data, proc_data, params,
                              window_size=window_size, n_position=n_position)
    assert out.shape == (B, 1)
    assert jnp.allclose(out, ref, rtol=1e-4, atol=1e-4), (out, ref)

    print("KERNEL_OK")
</pallas_src>

<mosaic_0001>
module attributes {stable_mosaic.version = 11 : i64} {
  func.func @value_net_kernel(%arg0: i32, %arg1: memref<2x8x7xf32, #tpu.memory_space<vmem>>, %arg2: memref<2x1xf32, #tpu.memory_space<vmem>>, %arg3: memref<2x64xf32, #tpu.memory_space<vmem>>, %arg4: memref<7x64xf32, #tpu.memory_space<vmem>>, %arg5: memref<1x64xf32, #tpu.memory_space<vmem>>, %arg6: memref<1x64xf32, #tpu.memory_space<vmem>>, %arg7: memref<1x64xf32, #tpu.memory_space<vmem>>, %arg8: memref<1x64xf32, #tpu.memory_space<vmem>>, %arg9: memref<1x1xf32, #tpu.memory_space<vmem>>, %arg10: memref<1x2xf32, #tpu.memory_space<vmem>>) attributes {dimension_semantics = [#tpu.dimension_semantics<parallel>], iteration_bounds = array<i64: 1>, scalar_prefetch = 0 : i64, scratch_operands = 0 : i64, tpu.core_type = #tpu.core_type<tc>, window_params = [{transform_indices = @transform_0, window_bounds = array<i64: 2, 8, 7>}, {transform_indices = @transform_1, window_bounds = array<i64: 2, 1>}, {transform_indices = @transform_2, window_bounds = array<i64: 2, 64>}, {pipeline_mode = #tpu.pipeline_mode<synchronous>, transform_indices = @transform_3, window_bounds = array<i64: 7, 64>}, {pipeline_mode = #tpu.pipeline_mode<synchronous>, transform_indices = @transform_4, window_bounds = array<i64: 1, 64>}, {pipeline_mode = #tpu.pipeline_mode<synchronous>, transform_indices = @transform_5, window_bounds = array<i64: 1, 64>}, {pipeline_mode = #tpu.pipeline_mode<synchronous>, transform_indices = @transform_6, window_bounds = array<i64: 1, 64>}, {pipeline_mode = #tpu.pipeline_mode<synchronous>, transform_indices = @transform_7, window_bounds = array<i64: 1, 64>}, {pipeline_mode = #tpu.pipeline_mode<synchronous>, transform_indices = @transform_8, window_bounds = array<i64: 1, 1>}, {transform_indices = @transform_9, window_bounds = array<i64: 1, 2>}]} {
    %c0 = arith.constant 0 : index
    %c0_0 = arith.constant 0 : index
    %c0_1 = arith.constant 0 : index
    %0 = vector.load %arg1[%c0, %c0_0, %c0_1] : memref<2x8x7xf32, #tpu.memory_space<vmem>>, vector<2x8x7xf32>
    %1 = vector.extract_strided_slice %0 {offsets = [0, 7, 2], sizes = [2, 1, 1], strides = [1, 1, 1]} : vector<2x8x7xf32> to vector<2x1x1xf32>
    %2 = tpu.iota {dimensions = array<i32: 2>} : vector<2x8x7xi32>
    %c3_i32 = arith.constant 3 : i32
    %3 = vector.broadcast %c3_i32 : i32 to vector<2x8x7xi32>
    %4 = arith.cmpi slt, %2, %3 : vector<2x8x7xi32>
    %5 = vector.broadcast %1 : vector<2x1x1xf32> to vector<2x8x7xf32>
    %6 = arith.divf %0, %5 : vector<2x8x7xf32>
    %cst = arith.constant 1.000000e+00 : f32
    %7 = vector.broadcast %cst : f32 to vector<2x8x7xf32>
    %8 = arith.select %4, %6, %7 : vector<2x8x7xi1>, vector<2x8x7xf32>
    %9 = math.log %8 : vector<2x8x7xf32>
    %10 = arith.select %4, %9, %0 : vector<2x8x7xi1>, vector<2x8x7xf32>
    %c0_2 = arith.constant 0 : index
    %c0_3 = arith.constant 0 : index
    %11 = vector.load %arg2[%c0_2, %c0_3] : memref<2x1xf32, #tpu.memory_space<vmem>>, vector<2x1xf32>
    %12 = vector.extract_strided_slice %0 {offsets = [0, 7, 2], sizes = [2, 1, 1], strides = [1, 1, 1]} : vector<2x8x7xf32> to vector<2x1x1xf32>
    %13 = vector.shape_cast %12 : vector<2x1x1xf32> to vector<2x1xf32>
    %cst_4 = arith.constant 0.000000e+00 : f32
    %14 = vector.broadcast %cst_4 : f32 to vector<2x1xf32>
    %15 = arith.cmpf ogt, %11, %14 : vector<2x1xf32>
    %cst_5 = arith.constant 1.000000e+00 : f32
    %16 = vector.broadcast %cst_5 : f32 to vector<2x1xf32>
    %17 = arith.select %15, %11, %16 : vector<2x1xi1>, vector<2x1xf32>
    %cst_6 = arith.constant 0.000000e+00 : f32
    %18 = vector.broadcast %cst_6 : f32 to vector<2x1xf32>
    %19 = arith.cmpf ogt, %11, %18 : vector<2x1xf32>
    %20 = arith.divf %17, %13 : vector<2x1xf32>
    %21 = math.log %20 : vector<2x1xf32>
    %cst_7 = arith.constant 0.000000e+00 : f32
    %22 = vector.broadcast %cst_7 : f32 to vector<2x1xf32>
    %23 = arith.select %19, %21, %22 : vector<2x1xi1>, vector<2x1xf32>
    %24 = vector.shape_cast %10 : vector<2x8x7xf32> to vector<16x7xf32>
    %c0_8 = arith.constant 0 : index
    %c0_9 = arith.constant 0 : index
    %25 = vector.load %arg4[%c0_8, %c0_9] : memref<7x64xf32, #tpu.memory_space<vmem>>, vector<7x64xf32>
    %cst_10 = arith.constant dense<0.000000e+00> : vector<16x64xf32>
    %26 = tpu.matmul %24, %25, %cst_10 {dimension_numbers = #tpu.dot_dimension_numbers<[1], [0], [0], [1], [0, 0, 1, 1], [], []>} : vector<16x7xf32>, vector<7x64xf32>, vector<16x64xf32> -> vector<16x64xf32>
    %c0_11 = arith.constant 0 : index
    %c0_12 = arith.constant 0 : index
    %27 = vector.load %arg5[%c0_11, %c0_12] : memref<1x64xf32, #tpu.memory_space<vmem>>, vector<1x64xf32>
    %28 = vector.broadcast %27 : vector<1x64xf32> to vector<16x64xf32>
    %29 = arith.addf %26, %28 : vector<16x64xf32>
    %cst_13 = arith.constant 0.000000e+00 : f32
    %30 = vector.broadcast %cst_13 : f32 to vector<16x64xf32>
    %31 = arith.maximumf %29, %30 : vector<16x64xf32>
    %32 = vector.shape_cast %31 : vector<16x64xf32> to vector<2x8x64xf32>
    %cst_14 = arith.constant dense<0.000000e+00> : vector<2x64xf32>
    %33 = vector.multi_reduction <add>, %32, %cst_14 [1] : vector<2x8x64xf32> to vector<2x64xf32>
    %c0_15 = arith.constant 0 : index
    %c0_16 = arith.constant 0 : index
    %34 = vector.load %arg3[%c0_15, %c0_16] : memref<2x64xf32, #tpu.memory_space<vmem>>, vector<2x64xf32>
    %c0_17 = arith.constant 0 : index
    %c0_18 = arith.constant 0 : index
    %35 = vector.load %arg6[%c0_17, %c0_18] : memref<1x64xf32, #tpu.memory_space<vmem>>, vector<1x64xf32>
    %36 = vector.broadcast %23 : vector<2x1xf32> to vector<2x64xf32>
    %37 = vector.broadcast %35 : vector<1x64xf32> to vector<2x64xf32>
    %38 = arith.mulf %36, %37 : vector<2x64xf32>
    %39 = arith.addf %34, %38 : vector<2x64xf32>
    %c0_19 = arith.constant 0 : index
    %c0_20 = arith.constant 0 : index
    %40 = vector.load %arg7[%c0_19, %c0_20] : memref<1x64xf32, #tpu.memory_space<vmem>>, vector<1x64xf32>
    %41 = vector.broadcast %40 : vector<1x64xf32> to vector<2x64xf32>
    %42 = arith.addf %39, %41 : vector<2x64xf32>
    %cst_21 = arith.constant 0.000000e+00 : f32
    %43 = vector.broadcast %cst_21 : f32 to vector<2x64xf32>
    %44 = arith.maximumf %42, %43 : vector<2x64xf32>
    %45 = arith.addf %33, %44 : vector<2x64xf32>
    %cst_22 = arith.constant 0.111111112 : f32
    %46 = vector.broadcast %cst_22 : f32 to vector<2x64xf32>
    %47 = arith.mulf %45, %46 : vector<2x64xf32>
    %c0_23 = arith.constant 0 : index
    %c0_24 = arith.constant 0 : index
    %48 = vector.load %arg8[%c0_23, %c0_24] : memref<1x64xf32, #tpu.memory_space<vmem>>, vector<1x64xf32>
    %49 = vector.broadcast %48 : vector<1x64xf32> to vector<2x64xf32>
    %50 = arith.mulf %47, %49 : vector<2x64xf32>
    %cst_25 = arith.constant dense<0.000000e+00> : vector<2xf32>
    %51 = vector.multi_reduction <add>, %50, %cst_25 [1] : vector<2x64xf32> to vector<2xf32>
    %52 = vector.shape_cast %51 : vector<2xf32> to vector<1x2xf32>
    %c0_26 = arith.constant 0 : index
    %c0_27 = arith.constant 0 : index
    %53 = vector.load %arg9[%c0_26, %c0_27] : memref<1x1xf32, #tpu.memory_space<vmem>>, vector<1x1xf32>
    %54 = vector.broadcast %53 : vector<1x1xf32> to vector<1x2xf32>
    %55 = arith.addf %52, %54 : vector<1x2xf32>
    %c0_28 = arith.constant 0 : index
    %c0_29 = arith.constant 0 : index
    %56 = vector.load %arg10[%c0_28, %c0_29] : memref<1x2xf32, #tpu.memory_space<vmem>>, vector<1x2xf32>
    tpu.vector_store %arg10[%c0_28, %c0_29], %55 {strides = array<i32>} : memref<1x2xf32, #tpu.memory_space<vmem>>, vector<1x2xf32>,
    return
  }
  func.func @transform_0(%arg0: i32) -> (i32, i32, i32) {
    %c0_i32 = arith.constant 0 : i32
    %c0_i32_0 = arith.constant 0 : i32
    %c0_i32_1 = arith.constant 0 : i32
    return %arg0, %c0_i32, %c0_i32_0 : i32, i32, i32
  }
  func.func @transform_1(%arg0: i32) -> (i32, i32) {
    %c0_i32 = arith.constant 0 : i32
    %c0_i32_0 = arith.constant 0 : i32
    return %arg0, %c0_i32 : i32, i32
  }
  func.func @transform_2(%arg0: i32) -> (i32, i32) {
    %c0_i32 = arith.constant 0 : i32
    %c0_i32_0 = arith.constant 0 : i32
    return %arg0, %c0_i32 : i32, i32
  }
  func.func @transform_3(%arg0: i32) -> (i32, i32) {
    %c0_i32 = arith.constant 0 : i32
    %c0_i32_0 = arith.constant 0 : i32
    %c0_i32_1 = arith.constant 0 : i32
    return %c0_i32, %c0_i32_0 : i32, i32
  }
  func.func @transform_4(%arg0: i32) -> (i32, i32) {
    %c0_i32 = arith.constant 0 : i32
    %c0_i32_0 = arith.constant 0 : i32
    %c0_i32_1 = arith.constant 0 : i32
    return %c0_i32, %c0_i32_0 : i32, i32
  }
  func.func @transform_5(%arg0: i32) -> (i32, i32) {
    %c0_i32 = arith.constant 0 : i32
    %c0_i32_0 = arith.constant 0 : i32
    %c0_i32_1 = arith.constant 0 : i32
    return %c0_i32, %c0_i32_0 : i32, i32
  }
  func.func @transform_6(%arg0: i32) -> (i32, i32) {
    %c0_i32 = arith.constant 0 : i32
    %c0_i32_0 = arith.constant 0 : i32
    %c0_i32_1 = arith.constant 0 : i32
    return %c0_i32, %c0_i32_0 : i32, i32
  }
  func.func @transform_7(%arg0: i32) -> (i32, i32) {
    %c0_i32 = arith.constant 0 : i32
    %c0_i32_0 = arith.constant 0 : i32
    %c0_i32_1 = arith.constant 0 : i32
    return %c0_i32, %c0_i32_0 : i32, i32
  }
  func.func @transform_8(%arg0: i32) -> (i32, i32) {
    %c0_i32 = arith.constant 0 : i32
    %c0_i32_0 = arith.constant 0 : i32
    %c0_i32_1 = arith.constant 0 : i32
    return %c0_i32, %c0_i32_0 : i32, i32
  }
  func.func @transform_9(%arg0: i32) -> (i32, i32) {
    %c0_i32 = arith.constant 0 : i32
    %c0_i32_0 = arith.constant 0 : i32
    return %c0_i32, %arg0 : i32, i32
  }
}

</mosaic_0001>

<bundles_post_ra>
// kernel: tpu_custom_call.1
= control target key start
LH: loop header
LB: loop body
LE: loop exit
PB: predicated region body
PF: predicated region fallthrough
CT: control target
= control target key end

     0   :  { %s416_s0 = inlined_call_operand.vmem [shape: f32[2,8,7], index: 0, kind: input, shape index: {}]   ;;  %s417_s1 = inlined_call_operand.vmem [shape: f32[2,1], index: 1, kind: input, shape index: {}]   ;;  %s418_s2 = inlined_call_operand.vmem [shape: f32[2,64], index: 2, kind: input, shape index: {}]   ;;  %s419_s3 = inlined_call_operand.vmem [shape: f32[7,64], index: 3, kind: input, shape index: {}]   ;;  %s420_s4 = inlined_call_operand.vmem [shape: f32[1,64], index: 4, kind: input, shape index: {}]   ;;  %s421_s5 = inlined_call_operand.vmem [shape: f32[1,64], index: 5, kind: input, shape index: {}]   ;;  %s422_s6 = inlined_call_operand.vmem [shape: f32[1,64], index: 6, kind: input, shape index: {}]   ;;  %s423_s7 = inlined_call_operand.vmem [shape: f32[1,64], index: 7, kind: input, shape index: {}]   ;;  %s424_s8 = inlined_call_operand.<no memory space> [shape: f32[1,1], index: 8, kind: input, shape index: {}]   ;;  %s425_s9 = inlined_call_operand.hbm [shape: f32[1,2], index: 9, kind: output, shape index: {}]  }
   0x1   :  { %v14_v0 = vstv %s424_s8 }
   0x2   :  { %15 = vst [vmem:[#allocation2] sm:$0x1] %v14_v0 }
   0x3   :  { %v360_v1 = vld [vmem:[%s416_s0] sm:$0xff]  ;;  %v365_v2 = vld [vmem:[%s416_s0 + $0x8] sm:$0xff]  ;;  %vm96_vm0 = vcmask 1041409  }
   0x4   :  { %v42_v3 = vrot.slane %v360_v1, 7  ;;  %v95_v4 = vrot.slane %v365_v2, 6 }
   0x5   :  { %16 = vsyncpa [#allocation4], 0  ;;  %s301_s15 = smov 126   ;;  %v43_v6 = vrot.slane %v365_v2, 7  ;;  %v119_v15 = vld [vmem:[%s419_s3] sm:$0x7f]  ;;  %v37_v31 = vlaneseq }
   0x6   :  { %44 = vrot.lane.b32.xlu0 %v42_v3, %s301_s15  ;;  %v97_v5 = vsel %vm96_vm0, %v95_v4, %v42_v3  ;;  %vm131_vm4 = vcmask 1046528   ;;  %v92_v19 = vld [vmem:[%s417_s1] sm:$0x3]  ;;  %v302_v30 = vmov 0   ;;  %s236_s28 = sshll.u32 %s425_s9, 4  ;;  %s237_s28 = int_to_ptr.hbm [resolvable:$true] %s236_s28 }
   0x7   :  { %98 = vrot.lane.b32.xlu1 %v97_v5, %s301_s15  ;;  %245 = vmatpush.msk.msra.mxu0 %vm131_vm4, %v119_v15  ;;  %vm93_vm5 = vcmp.gt.f32.partialorder %v92_v19, 0.0  ;;  %v379_v38 = vand.u32 127, %v37_v31  ;;  %v259_v63 = vld [vmem:[%s420_s4] ss:$0 sm:$0xff] }
   0x8   :  { %248 = vmatpush.msk.msra.mxu1 %vm131_vm4, %v119_v15  ;;  %v94_v21 = vsel %vm93_vm5, %v92_v19, 1.0  ;;  %256 = vset.pattern.permute.xlu1 %v302_v30  ;;  %v261_v15 = vld [vmem:[%s422_s6] ss:$0 sm:$0xff]  ;;  %s303_s6 = smov [#allocation3]   ;;  %vm227_vm4 = vcmask 8192  }
   0x9   :  { %v216_v26 = vld [vmem:[#allocation2] sm:$0x1]  ;;  %257 = vset.pattern.permute.xlu2 %v302_v30  ;;  %258 = vset.pattern.permute.xlu0 %v302_v30  ;;  %vm39_vm11 = vcmp.lt.s32.totalorder %v379_v38, 3  ;;  %s234_s25 = sshll.u32 %s303_s6, 4  ;;  %s235_s25 = int_to_ptr.vmem [resolvable:$true] %s234_s25 }
   0xa   :  { %219 = vperm.xlu2 %257, %v216_v26  }
   0xe   :  { %46 = vrot.lane.b32.xlu0 %v43_v6, %s301_s15 }
  0x78   :  { %v45_v7 = vpop.permute.xlu0 %44 }
  0x79   :  { %249 = vpush %v45_v7  ;;  %v99_v9 = vpop.permute.xlu1 %98 }
  0x7a   :  { %263 = vrcp.f32 %v99_v9  ;;  %vm106_vm1 = vweird.f32 %v99_v9  ;;  %v112_v14 = vand.u32 2147483648, %v99_v9  ;;  %v110_v18 = vand.u32 2147483647, %v99_v9 }
  0x7c   :  { %v113_v16 = vor.u32 1.1754944e-38, %v112_v14  ;;  %vm111_vm6 = vcmp.eq.f32.partialorder %v110_v18, 8.507059e+37 }
  0x80   :  { %v47_v8 = vpop.permute.xlu0 %46  ;;  %v264_v10 = vpop.eup %263 }
  0x81   :  { %251 = vpush %v47_v8  ;;  %v102_v11 = vmul.f32 %v264_v10, %v99_v9  ;;  %vm107_vm2 = vweird.f32 %v264_v10 }
  0x82   :  { %vm108_vm3 = vmor %vm106_vm1, %vm107_vm2  ;;  %vm124_vm1 = vcmask 56320   ;;  %vm160_vm2 = vcmask 523264  }
  0x83   :  { %v103_v12 = vsub.f32 1.0, %v102_v11 }
  0x85   :  { %v104_v13 = vmul.f32 %v264_v10, %v103_v12 }
  0x87   :  { %v105_v17 = vadd.f32 %v264_v10, %v104_v13 }
  0x89   :  { %v109_v20 = vsel %vm108_vm3, %v264_v10, %v105_v17  ;;  %v175_v10 = vld [vmem:[%s418_s2] sm:$0x3]  ;;  %vm212_vm3 = vcmask 517120  }
  0x8a   :  { %v114_v22 = vsel %vm111_vm6, %v113_v16, %v109_v20 }
  0x8b   :  { %v115_v24 = vmul.f32 %v114_v22, %v94_v21 }
  0xaa   :  { %s250_s18 = spop %249 }
  0xab   :  { %v49_v23 = vstv %s250_s18 }
  0xac   :  { %265 = vrcp.f32 %v49_v23  ;;  %v65_v34 = vand.u32 2147483648, %v49_v23  ;;  %v63_v36 = vand.u32 2147483647, %v49_v23  ;;  %vm59_vm8 = vweird.f32 %v49_v23 }
  0xad   :  { %267 = vlog2.f32 %v115_v24 }
  0xae   :  { %v66_v41 = vor.u32 1.1754944e-38, %v65_v34  ;;  %vm64_vm10 = vcmp.eq.f32.partialorder %v63_v36, 8.507059e+37 }
  0xb2   :  { %v266_v25 = vpop.eup %265  ;;  %s252_s3 = spop %251 }
  0xb3   :  { %v268_v27 = vpop.eup %267  ;;  %v55_v28 = vmul.f32 %v266_v25, %v49_v23  ;;  %v52_v29 = vstv %s252_s3  ;;  %vm60_vm7 = vweird.f32 %v266_v25 }
  0xb4   :  { %269 = vrcp.f32 %v52_v29  ;;  %v117_v33 = vmul.f32 0.6931472, %v268_v27  ;;  %vm61_vm9 = vmor %vm59_vm8, %vm60_vm7  ;;  %v80_v47 = vand.u32 2147483648, %v52_v29  ;;  %v78_v49 = vand.u32 2147483647, %v52_v29 }
  0xb5   :  { %v56_v32 = vsub.f32 1.0, %v55_v28  ;;  %vm74_vm13 = vweird.f32 %v52_v29 }
  0xb6   :  { %v118_v37 = vsel %vm93_vm5, %v117_v33, 0.0  ;;  %v81_v52 = vor.u32 1.1754944e-38, %v80_v47  ;;  %vm79_vm15 = vcmp.eq.f32.partialorder %v78_v49, 8.507059e+37  ;;  %v262_v33 = vld [vmem:[%s423_s7] ss:$0 sm:$0xff] }
  0xb7   :  { %v57_v35 = vmul.f32 %v266_v25, %v56_v32  ;;  %179 = vperm.xlu1 %256, %v118_v37  }
  0xb9   :  { %v58_v39 = vadd.f32 %v266_v25, %v57_v35 }
  0xba   :  { %v270_v40 = vpop.eup %269 }
  0xbb   :  { %v62_v42 = vsel %vm61_vm9, %v266_v25, %v58_v39  ;;  %v70_v43 = vmul.f32 %v270_v40, %v52_v29  ;;  %vm75_vm12 = vweird.f32 %v270_v40 }
  0xbc   :  { %v67_v44 = vsel %vm64_vm10, %v66_v41, %v62_v42  ;;  %vm76_vm14 = vmor %vm74_vm13, %vm75_vm12 }
  0xbd   :  { %v71_v45 = vsub.f32 1.0, %v70_v43  ;;  %v68_v46 = vmul.f32 %v67_v44, %v360_v1 }
  0xbf   :  { %v72_v48 = vmul.f32 %v270_v40, %v71_v45  ;;  %v84_v50 = vsel %vm39_vm11, %v68_v46, 1.0 }
  0xc0   :  { %271 = vlog2.f32 %v84_v50 }
  0xc1   :  { %v73_v51 = vadd.f32 %v270_v40, %v72_v48 }
  0xc3   :  { %v77_v53 = vsel %vm76_vm14, %v270_v40, %v73_v51  ;;  %v220_v40 = vpop.permute.xlu2 %219 }
  0xc4   :  { %v82_v54 = vsel %vm79_vm15, %v81_v52, %v77_v53  ;;  %v222_v41 = vperm.slane %v220_v40, 0 }
  0xc5   :  { %v83_v55 = vmul.f32 %v82_v54, %v365_v2 }
  0xc6   :  { %v272_v56 = vpop.eup %271 }
  0xc7   :  { %v87_v57 = vmul.f32 0.6931472, %v272_v56  ;;  %v85_v58 = vsel %vm39_vm11, %v83_v55, 1.0 }
  0xc8   :  { %273 = vlog2.f32 %v85_v58 }
  0xc9   :  { %v90_v59 = vsel %vm39_vm11, %v87_v57, %v360_v1  ;;  %v260_v1 = vld [vmem:[%s421_s5] ss:$0 sm:$0xff] }
  0xca   :  { %246 = vmatmul.msk.f32.vlgmr.msra.gmra.mxu0 %vm124_vm1, %v90_v59 }
  0xce   :  { %v274_v60 = vpop.eup %273 }
  0xcf   :  { %v89_v61 = vmul.f32 0.6931472, %v274_v60 }
  0xd1   :  { %v91_v62 = vsel %vm39_vm11, %v89_v61, %v365_v2 }
  0xd2   :  { %247 = vmatmul.msk.f32.vlgmr.msra.gmra.mxu1 %vm124_vm1, %v91_v62 }
 0x129   :  { %v180_v6 = vpop.permute.xlu1 %179 }
 0x12a   :  { %v185_v9 = vmul.f32 %v260_v1, %v180_v6 }
 0x12c   :  { %v186_v16 = vadd.f32 %v185_v9, %v175_v10 }
 0x12e   :  { %v191_v20 = vadd.f32 %v261_v15, %v186_v16 }
 0x130   :  { %v192_v24 = vmax.f32 %v191_v20, 0.0 }
 0x132   :  { %v194_v27 = vrot.slane %v192_v24, 1 }
 0x147   :  { %v152_v0 = vpop.f32.mrf.mxu0 }
 0x148   :  { %v153_v3 = vadd.f32 %v259_v63, %v152_v0 }
 0x14a   :  { %v158_v4 = vmax.f32 %v153_v3, 0.0 }
 0x14c   :  { %v161_v5 = vsel %vm160_vm2, %v158_v4, 0.0 }
 0x14d   :  { %v162_v7 = vrot.slane %v161_v5, 4 }
 0x14f   :  { %v163_v8 = vadd.f32 %v162_v7, %v161_v5  ;;  %v155_v2 = vpop.f32.mrf.mxu1 }
 0x150   :  { %v156_v11 = vadd.f32 %v259_v63, %v155_v2 }
 0x151   :  { %v164_v12 = vrot.slane %v163_v8, 2 }
 0x152   :  { %v159_v13 = vmax.f32 %v156_v11, 0.0 }
 0x153   :  { %v165_v14 = vadd.f32 %v164_v12, %v163_v8 }
 0x154   :  { %v168_v17 = vsel %vm160_vm2, %v159_v13, 0.0 }
 0x155   :  { %v169_v18 = vrot.slane %v168_v17, 4  ;;  %v166_v19 = vrot.slane %v165_v14, 1 }
 0x157   :  { %v170_v21 = vadd.f32 %v169_v18, %v168_v17  ;;  %v167_v23 = vadd.f32 %v166_v19, %v165_v14 }
 0x159   :  { %v171_v22 = vrot.slane %v170_v21, 2  ;;  %v197_v28 = vadd.f32 %v192_v24, %v167_v23 }
 0x15b   :  { %v172_v25 = vadd.f32 %v171_v22, %v170_v21  ;;  %v199_v31 = vmul.f32 0.11111111, %v197_v28 }
 0x15d   :  { %v173_v26 = vrot.slane %v172_v25, 1  ;;  %v205_v35 = vmul.f32 %v262_v33, %v199_v31 }
 0x15f   :  { %v174_v29 = vadd.f32 %v173_v26, %v172_v25 }
 0x161   :  { %v198_v30 = vadd.f32 %v194_v27, %v174_v29 }
 0x163   :  { %v200_v32 = vmul.f32 0.11111111, %v198_v30 }
 0x165   :  { %v206_v34 = vmul.f32 %v262_v33, %v200_v32 }
 0x167   :  { %v209_v36 = vrot.slane %v206_v34, 7 }
 0x169   :  { %v210_v37 = vsel %vm96_vm0, %v209_v36, %v205_v35 }
 0x16a   :  { %v213_v39 = vsel %vm212_vm3, %v210_v37, 0.0 }
 0x16b   :  { %214 = vadd.xlane.f32.xlu2 %v213_v39 }
 0x1de   :  { %v215_v42 = vpop.xlane.xlu2 %214 }
 0x1df   :  { %v223_v43 = vadd.f32 %v222_v41, %v215_v42 }
 0x1e1   :  { %v225_v44 = vperm.slane %v223_v43, %v379_v38 }
 0x1e3   :  { %228 = vst.msk [vmem:[#allocation3] sm:$0x1] %vm227_vm4, %v225_v44 }
 0x1e4   :  { %239 = dma.vmem_to_hbm [thread:$0]  %s235_s25, 16, %s237_s28, [#allocation4]  }
 0x1e5   :  { %299 = dma.done.wait [#allocation4], 16  }
 0x1e6   :  { %300 = vsyncadd [#allocation4], 4294967280 }
 0x1e7   :  { %244 = vsyncpa [#allocation4], 1 }

</bundles_post_ra>
